<compile_context>
chip_gen: v7x
topology: tpu7x:2x2x1
jax: 0.10.0
libtpu: 0.0.40
codegen_flags: <defaults>
</compile_context>

<pallas_src>
import jax
import jax.numpy as jnp
from jax import lax
from jax.experimental import pallas as pl
from jax.experimental.pallas import tpu as pltpu

_LANES = 128
_MAX_TILE_BYTES = 4 << 20  # per-input tile; x2 inputs x2 buffers = 16 MiB max


def _cdiv(a, b):
    return -(-a // b)


def _round_up(a, b):
    return _cdiv(a, b) * b


def _num_tensorcores():
    """2 TensorCores per chip only on v7x; v5e/v6e are single-TC."""
    try:
        kind = (getattr(jax.devices()[0], "device_kind", "") or "").lower()
        if "v7" in kind or "7x" in kind:
            return 2
    except Exception:
        pass
    return 1


def _select_tiling(n_elems, itemsize, num_cores):
    """Pick (no_pad, num_shards, num_tiles, tile_rows, rows_valid, rows_covered)."""
    sub = max(8, 32 // itemsize)              # sublane multiple: f32->8, bf16->16
    rows_valid = _cdiv(n_elems, _LANES)
    lane_aligned = (n_elems % _LANES == 0)
    # No-pad path requires a clean (rows_valid, 128) reshape and a block that
    # does not exceed the (unpadded) leading array dim.
    no_pad = lane_aligned and rows_valid >= sub

    max_tile_rows = _MAX_TILE_BYTES // (_LANES * itemsize)   # 8192 f32 / 16384 bf16
    if no_pad:
        max_tile_rows = min(max_tile_rows, (rows_valid // sub) * sub)

    num_shards = 2 if (num_cores >= 2 and rows_valid >= 2 * sub) else 1
    rows_per_shard = _cdiv(rows_valid, num_shards)
    num_tiles = _cdiv(rows_per_shard, max_tile_rows)
    tile_rows = min(max_tile_rows,
                    _round_up(_cdiv(rows_per_shard, num_tiles), sub))
    rows_covered = num_shards * num_tiles * tile_rows        # >= rows_valid
    return no_pad, num_shards, num_tiles, tile_rows, rows_valid, rows_covered


def _pad_flat(x, padded_len, pad_value):
    flat = x.reshape(-1)
    pad = padded_len - flat.shape[0]
    if pad == 0:
        return flat
    return jnp.pad(flat, (0, pad), constant_values=pad_value)


def _make_kernel(tile_rows, num_tiles, mask_rows):
    folds = tile_rows // 8  # tile_rows is always a multiple of 8

    def kernel(sr_ref, hr_ref, out_ref, acc_ref):
        i = pl.program_id(1)

        @pl.when(i == 0)
        def _():
            acc_ref[...] = jnp.zeros_like(acc_ref)

        sr = sr_ref[...].astype(jnp.float32)
        hr = hr_ref[...].astype(jnp.float32)

        # Numerically-stable BCEWithLogits, merged (same element count) with a
        # single fused log (2 exps + 1 log per element pair):
        #   target=0 (sr): softplus(x)  = max(x,0)  + log1p(exp(-|x|))
        #   target=1 (hr): softplus(-x) = max(-x,0) + log1p(exp(-|x|))
        t = (1.0 + jnp.exp(-jnp.abs(sr))) * (1.0 + jnp.exp(-jnp.abs(hr)))
        sp = jnp.maximum(sr, 0.0) + jnp.maximum(-hr, 0.0) + jnp.log(t)

        if mask_rows is not None:
            # Zero contributions from rows past the end of the (unpadded) array
            # in the overrunning last tile.  Few VPU ops, hidden under DMA.
            base = (pl.program_id(0) * num_tiles + i) * tile_rows
            row_ids = base + lax.broadcasted_iota(
                jnp.int32, (tile_rows, _LANES), 0)
            sp = jnp.where(row_ids < mask_rows, sp, 0.0)

        # Fold the (tile_rows,128) tile into one (8,128) block of per-lane
        # partial sums (layout-preserving reshape, pure VPU adds) and
        # accumulate into the small resident VMEM block.
        acc_ref[...] += jnp.sum(sp.reshape(folds, 8, _LANES), axis=0)

        @pl.when(i == pl.num_programs(1) - 1)
        def _():
            out_ref[...] = acc_ref[...]

    return kernel


def discriminator_loss(sr_labels, hr_labels):
    """BCEWithLogits-based discriminator loss (scalar), computed in Pallas."""
    assert sr_labels.shape == hr_labels.shape, "sr/hr logits must have identical shapes"
    assert sr_labels.dtype == hr_labels.dtype, "sr/hr logits must have identical dtypes"

    n = sr_labels.size
    itemsize = jnp.dtype(sr_labels.dtype).itemsize
    (no_pad, num_shards, num_tiles, tile_rows,
     rows_valid, rows_covered) = _select_tiling(n, itemsize, _num_tensorcores())

    if no_pad:
        # Free reshape of the contiguous flat data; no extra HBM traffic.
        sr2d = sr_labels.reshape(rows_valid, _LANES)
        hr2d = hr_labels.reshape(rows_valid, _LANES)
        mask_rows = rows_valid if rows_covered > rows_valid else None
    else:
        # Rare ragged fallback (size not a multiple of 128, or tiny input):
        # pad values chosen so softplus(sr_pad) == softplus(-hr_pad) == 0.
        padded_len = rows_covered * _LANES
        sr2d = _pad_flat(sr_labels, padded_len, -1e30).reshape(rows_covered, _LANES)
        hr2d = _pad_flat(hr_labels, padded_len, +1e30).reshape(rows_covered, _LANES)
        mask_rows = None

    tile_bytes = tile_rows * _LANES * itemsize
    params = dict(dimension_semantics=("parallel", "arbitrary"))
    vmem_est = (2 * 2 * tile_bytes            # double-buffered inputs
                + 8 * _LANES * 4              # (8,128) f32 accumulator
                + 2 * num_shards * 8 * _LANES * 4)   # output blocks
    if vmem_est > 14 * (1 << 20):
        # Exceeds v5e's 16 MiB default scoped VMEM; set explicitly with headroom.
        params["vmem_limit_bytes"] = vmem_est + (4 << 20)

    partials = pl.pallas_call(
        _make_kernel(tile_rows, num_tiles, mask_rows),
        out_shape=jax.ShapeDtypeStruct((num_shards * 8, _LANES), jnp.float32),
        grid_spec=pltpu.PrefetchScalarGridSpec(
            num_scalar_prefetch=0,
            grid=(num_shards, num_tiles),
            in_specs=[
                pl.BlockSpec((tile_rows, _LANES),
                             lambda s, i, nt=num_tiles: (s * nt + i, 0)),
                pl.BlockSpec((tile_rows, _LANES),
                             lambda s, i, nt=num_tiles: (s * nt + i, 0)),
            ],
            out_specs=pl.BlockSpec((8, _LANES), lambda s, i: (s, 0)),
            scratch_shapes=[pltpu.VMEM((8, _LANES), jnp.float32)],
        ),
        compiler_params=pltpu.CompilerParams(**params),
    )(sr2d, hr2d)

    # Tiny (num_shards*8, 128) cross-lane reduce + /n left to XLA.
    return jnp.sum(partials) / jnp.float32(n)


def _reference(sr_labels, hr_labels):
    """Pure-JAX reference: BCEWithLogits(hr, ones) + BCEWithLogits(sr, zeros)."""
    def softplus(x):
        return jnp.maximum(x, 0.0) + jnp.log1p(jnp.exp(-jnp.abs(x)))
    hr = hr_labels.astype(jnp.float32)
    sr = sr_labels.astype(jnp.float32)
    return jnp.mean(softplus(-hr)) + jnp.mean(softplus(sr))


if __name__ == "__main__":
    key = jax.random.PRNGKey(0)
    k_sr, k_hr = jax.random.split(key)

    # Small patch-discriminator-like logits, NCHW: [B=2, C=4, H=16, W=16]
    shape = (2, 4, 16, 16)
    sr = jax.random.normal(k_sr, shape, dtype=jnp.float32)
    hr = jax.random.normal(k_hr, shape, dtype=jnp.float32) + 1.0

    # f32, fully aligned (no pad, no mask).
    loss = jax.block_until_ready(discriminator_loss(sr, hr))
    ref = _reference(sr, hr)
    assert jnp.allclose(loss, ref, rtol=1e-5, atol=1e-5), (loss, ref)

    # bf16 inputs fed without upcasting in the wrapper (halves HBM traffic).
    sr_bf, hr_bf = sr.astype(jnp.bfloat16), hr.astype(jnp.bfloat16)
    loss_bf = jax.block_until_ready(discriminator_loss(sr_bf, hr_bf))
    ref_bf = _reference(sr_bf, hr_bf)
    assert jnp.allclose(loss_bf, ref_bf, rtol=1e-5, atol=1e-5), (loss_bf, ref_bf)

    # Lane-aligned but sublane-ragged size (rows=27): exercises the in-kernel
    # masked-tail path with NO wrapper-side pad copy.
    shape2 = (27, 128)
    sr2 = jax.random.normal(k_sr, shape2, dtype=jnp.float32)
    hr2 = jax.random.normal(k_hr, shape2, dtype=jnp.float32) + 1.0
    loss2 = jax.block_until_ready(discriminator_loss(sr2, hr2))
    ref2 = _reference(sr2, hr2)
    assert jnp.allclose(loss2, ref2, rtol=1e-5, atol=1e-5), (loss2, ref2)

    # Flattened size not a multiple of 128: exercises the rare padded fallback.
    shape3 = (3, 1, 10, 10)
    sr3 = jax.random.normal(k_sr, shape3, dtype=jnp.float32)
    hr3 = jax.random.normal(k_hr, shape3, dtype=jnp.float32) + 1.0
    loss3 = jax.block_until_ready(discriminator_loss(sr3, hr3))
    ref3 = _reference(sr3, hr3)
    assert jnp.allclose(loss3, ref3, rtol=1e-5, atol=1e-5), (loss3, ref3)

    print("KERNEL_OK")
</pallas_src>

<mosaic_0001>
module attributes {stable_mosaic.version = 11 : i64} {
  func.func @kernel(%arg0: i32, %arg1: i32, %arg2: memref<16x128xf32, #tpu.memory_space<vmem>>, %arg3: memref<16x128xf32, #tpu.memory_space<vmem>>, %arg4: memref<8x128xf32, #tpu.memory_space<vmem>>, %arg5: memref<8x128xf32, #tpu.memory_space<vmem>>) attributes {dimension_semantics = [#tpu.dimension_semantics<parallel>, #tpu.dimension_semantics<arbitrary>], iteration_bounds = array<i64: 1, 1>, scalar_prefetch = 0 : i64, scratch_operands = 1 : i64, tpu.core_type = #tpu.core_type<tc>, window_params = [{transform_indices = @transform_0, window_bounds = array<i64: 16, 128>}, {transform_indices = @transform_1, window_bounds = array<i64: 16, 128>}, {transform_indices = @transform_2, window_bounds = array<i64: 8, 128>}]} {
    %c0_i32 = arith.constant 0 : i32
    %0 = arith.cmpi eq, %arg1, %c0_i32 : i32
    %1 = arith.extui %0 : i1 to i32
    %c0_i32_0 = arith.constant 0 : i32
    %2 = arith.cmpi ne, %1, %c0_i32_0 : i32
    scf.if %2 {
      %cst_17 = arith.constant 0.000000e+00 : f32
      %35 = vector.broadcast %cst_17 : f32 to vector<8x128xf32>
      %c0_18 = arith.constant 0 : index
      %c0_19 = arith.constant 0 : index
      %36 = vector.load %arg5[%c0_18, %c0_19] : memref<8x128xf32, #tpu.memory_space<vmem>>, vector<8x128xf32>
      tpu.vector_store %arg5[%c0_18, %c0_19], %35 {strides = array<i32>} : memref<8x128xf32, #tpu.memory_space<vmem>>, vector<8x128xf32>,
    } else {
    }
    %c0 = arith.constant 0 : index
    %c0_1 = arith.constant 0 : index
    %3 = vector.load %arg2[%c0, %c0_1] : memref<16x128xf32, #tpu.memory_space<vmem>>, vector<16x128xf32>
    %c0_2 = arith.constant 0 : index
    %c0_3 = arith.constant 0 : index
    %4 = vector.load %arg3[%c0_2, %c0_3] : memref<16x128xf32, #tpu.memory_space<vmem>>, vector<16x128xf32>
    %5 = math.absf %3 : vector<16x128xf32>
    %cst = arith.constant 0.000000e+00 : f32
    %6 = vector.broadcast %cst : f32 to vector<16x128xf32>
    %7 = arith.subf %6, %5 : vector<16x128xf32>
    %8 = math.exp %7 : vector<16x128xf32>
    %cst_4 = arith.constant 1.000000e+00 : f32
    %9 = vector.broadcast %cst_4 : f32 to vector<16x128xf32>
    %10 = arith.addf %9, %8 : vector<16x128xf32>
    %11 = math.absf %4 : vector<16x128xf32>
    %cst_5 = arith.constant 0.000000e+00 : f32
    %12 = vector.broadcast %cst_5 : f32 to vector<16x128xf32>
    %13 = arith.subf %12, %11 : vector<16x128xf32>
    %14 = math.exp %13 : vector<16x128xf32>
    %cst_6 = arith.constant 1.000000e+00 : f32
    %15 = vector.broadcast %cst_6 : f32 to vector<16x128xf32>
    %16 = arith.addf %15, %14 : vector<16x128xf32>
    %17 = arith.mulf %10, %16 : vector<16x128xf32>
    %cst_7 = arith.constant 0.000000e+00 : f32
    %18 = vector.broadcast %cst_7 : f32 to vector<16x128xf32>
    %19 = arith.maximumf %3, %18 : vector<16x128xf32>
    %cst_8 = arith.constant 0.000000e+00 : f32
    %20 = vector.broadcast %cst_8 : f32 to vector<16x128xf32>
    %21 = arith.subf %20, %4 : vector<16x128xf32>
    %cst_9 = arith.constant 0.000000e+00 : f32
    %22 = vector.broadcast %cst_9 : f32 to vector<16x128xf32>
    %23 = arith.maximumf %21, %22 : vector<16x128xf32>
    %24 = arith.addf %19, %23 : vector<16x128xf32>
    %25 = math.log %17 : vector<16x128xf32>
    %26 = arith.addf %24, %25 : vector<16x128xf32>
    %c0_10 = arith.constant 0 : index
    %c0_11 = arith.constant 0 : index
    %27 = vector.load %arg5[%c0_10, %c0_11] : memref<8x128xf32, #tpu.memory_space<vmem>>, vector<8x128xf32>
    %28 = vector.shape_cast %26 : vector<16x128xf32> to vector<2x8x128xf32>
    %cst_12 = arith.constant dense<0.000000e+00> : vector<8x128xf32>
    %29 = vector.multi_reduction <add>, %28, %cst_12 [0] : vector<2x8x128xf32> to vector<8x128xf32>
    %30 = arith.addf %27, %29 : vector<8x128xf32>
    %c0_13 = arith.constant 0 : index
    %c0_14 = arith.constant 0 : index
    %31 = vector.load %arg5[%c0_13, %c0_14] : memref<8x128xf32, #tpu.memory_space<vmem>>, vector<8x128xf32>
    tpu.vector_store %arg5[%c0_13, %c0_14], %30 {strides = array<i32>} : memref<8x128xf32, #tpu.memory_space<vmem>>, vector<8x128xf32>,
    %c0_i32_15 = arith.constant 0 : i32
    %32 = arith.cmpi eq, %arg1, %c0_i32_15 : i32
    %33 = arith.extui %32 : i1 to i32
    %c0_i32_16 = arith.constant 0 : i32
    %34 = arith.cmpi ne, %33, %c0_i32_16 : i32
    scf.if %34 {
      %c0_17 = arith.constant 0 : index
      %c0_18 = arith.constant 0 : index
      %35 = vector.load %arg5[%c0_17, %c0_18] : memref<8x128xf32, #tpu.memory_space<vmem>>, vector<8x128xf32>
      %c0_19 = arith.constant 0 : index
      %c0_20 = arith.constant 0 : index
      %36 = vector.load %arg4[%c0_19, %c0_20] : memref<8x128xf32, #tpu.memory_space<vmem>>, vector<8x128xf32>
      tpu.vector_store %arg4[%c0_19, %c0_20], %35 {strides = array<i32>} : memref<8x128xf32, #tpu.memory_space<vmem>>, vector<8x128xf32>,
    } else {
    }
    return
  }
  func.func @transform_0(%arg0: i32, %arg1: i32) -> (i32, i32) {
    %c1_i32 = arith.constant 1 : i32
    %0 = arith.muli %arg0, %c1_i32 : i32
    %1 = arith.addi %0, %arg1 : i32
    %c0_i32 = arith.constant 0 : i32
    %c0_i32_0 = arith.constant 0 : i32
    return %1, %c0_i32 : i32, i32
  }
  func.func @transform_1(%arg0: i32, %arg1: i32) -> (i32, i32) {
    %c1_i32 = arith.constant 1 : i32
    %0 = arith.muli %arg0, %c1_i32 : i32
    %1 = arith.addi %0, %arg1 : i32
    %c0_i32 = arith.constant 0 : i32
    %c0_i32_0 = arith.constant 0 : i32
    return %1, %c0_i32 : i32, i32
  }
  func.func @transform_2(%arg0: i32, %arg1: i32) -> (i32, i32) {
    %c0_i32 = arith.constant 0 : i32
    %c0_i32_0 = arith.constant 0 : i32
    return %arg0, %c0_i32 : i32, i32
  }
}

</mosaic_0001>

<bundles_post_ra>
// kernel: tpu_custom_call.1
= control target key start
LH: loop header
LB: loop body
LE: loop exit
PB: predicated region body
PF: predicated region fallthrough
CT: control target
= control target key end

     0   :  { %7 = vsyncpa [#allocation4], 0  ;;  %s267_s0 = inlined_call_operand.hbm [shape: f32[16,128], index: 0, kind: input, shape index: {}]   ;;  %s268_s1 = inlined_call_operand.hbm [shape: f32[16,128], index: 1, kind: input, shape index: {}]   ;;  %s269_s2 = inlined_call_operand.hbm [shape: f32[8,128], index: 2, kind: output, shape index: {}]  }
   0x1   :  { %8 = vsyncpa [#allocation7], 0 }
   0x2   :  { %9 = vsyncpa [#allocation5], 0  ;;  %s211_s9 = smov [#allocation3]   ;;  %s139_s13 = scalar_lea.hbm %s267_s0, 256 }
   0x3   :  { %s19_s10 = sshll.u32 %s211_s9, 4  ;;  %p140_p0 = scmp.ne.s32.totalorder %s267_s0, %s139_s13  ;;  %s20_s10 = int_to_ptr.vmem [resolvable:$true] %s19_s10 }
   0x4   :  { %p143_p1 = scmp.lt.u32.totalorder %s139_s13, %s267_s0 }
   0x6   :  { %p145_p2 = pnand %p143_p1, %p140_p0 }
   0x8   :  { %148 = shalt.err (!%p145_p2)
}
   0x9   :  { %s149_s18 = scalar_lea.vmem %s20_s10, 256  ;;  %p154_p4 = scmp.lt.s32.totalorder %s20_s10, %s20_s10 }
   0xa   :  { %p150_p3 = scmp.ne.s32.totalorder %s20_s10, %s149_s18  ;;  %p155_p5 = scmp.lt.s32.totalorder %s149_s18, %s149_s18 }
   0xc   :  { %p156_p6 = por %p155_p5, %p154_p4 }
   0xe   :  { %p157_p7 = pnand %p156_p6, %p150_p3 }
  0x10   :  { %160 = shalt.err (!%p157_p7)
}
  0x11   :  { %s212_s19 = smov 128   ;;  %s213_s20 = smov 8  }
  0x12   :  { %25 = dma.hbm_to_vmem [thread:$0]  %s267_s0, 256, %s20_s10, [#allocation4], %s212_s19, %s212_s19, %s213_s20  }
  0x13   :  { %s214_s23 = smov [#allocation6]   ;;  %s161_s27 = scalar_lea.hbm %s268_s1, 256 }
  0x14   :  { %s35_s24 = sshll.u32 %s214_s23, 4  ;;  %p162_p8 = scmp.ne.s32.totalorder %s268_s1, %s161_s27  ;;  %s36_s24 = int_to_ptr.vmem [resolvable:$true] %s35_s24 }
  0x15   :  { %p165_p9 = scmp.lt.u32.totalorder %s161_s27, %s268_s1 }
  0x17   :  { %p167_p10 = pnand %p165_p9, %p162_p8 }
  0x19   :  { %170 = shalt.err (!%p167_p10)
}
  0x1a   :  { %s171_s4 = scalar_lea.vmem %s36_s24, 256  ;;  %p176_p12 = scmp.lt.s32.totalorder %s36_s24, %s36_s24 }
  0x1b   :  { %p172_p11 = scmp.ne.s32.totalorder %s36_s24, %s171_s4  ;;  %p177_p13 = scmp.lt.s32.totalorder %s171_s4, %s171_s4 }
  0x1d   :  { %p178_p0 = por %p177_p13, %p176_p12 }
  0x1f   :  { %p179_p1 = pnand %p178_p0, %p172_p11 }
  0x21   :  { %182 = shalt.err (!%p179_p1)
}
  0x22   :  { %41 = dma.hbm_to_vmem [thread:$0]  %s268_s1, 256, %s36_s24, [#allocation7], %s212_s19, %s212_s19, %s213_s20  }
  0x23   :  { %205 = dma.done.wait [#allocation4], 256  }
  0x24   :  { %206 = vsyncadd [#allocation4], 4294967040 }
  0x25   :  { %207 = dma.done.wait [#allocation7], 256  }
  0x26   :  { %208 = vsyncadd [#allocation7], 4294967040  ;;  %v57_v0 = vld [vmem:[#allocation3] sm:$0xff]  ;;  %v58_v1 = vld [vmem:[#allocation3 + $0x8] sm:$0xff]  ;;  %s215_s1 = smov [#allocation8]  }
  0x27   :  { %v59_v2 = vld [vmem:[#allocation6] sm:$0xff]  ;;  %v60_v3 = vld [vmem:[#allocation6 + $0x8] sm:$0xff]  ;;  %v61_v4 = vand.u32 2147483647, %v57_v0  ;;  %v62_v5 = vand.u32 2147483647, %v58_v1 }
  0x28   :  { %v71_v6 = vand.u32 2147483647, %v59_v2  ;;  %v72_v7 = vand.u32 2147483647, %v60_v3  ;;  %v85_v26 = vsub.f32 0.0, %v59_v2  ;;  %v86_v27 = vsub.f32 0.0, %v60_v3 }
  0x29   :  { %v63_v8 = vsub.f32 0.0, %v61_v4  ;;  %v64_v9 = vsub.f32 0.0, %v62_v5  ;;  %v83_v28 = vmax.f32 %v57_v0, 0.0  ;;  %v84_v30 = vmax.f32 %v58_v1, 0.0  ;;  %s112_s6 = sshll.u32 %s215_s1, 4  ;;  %s113_s6 = int_to_ptr.vmem [resolvable:$true] %s112_s6 }
  0x2a   :  { %v73_v10 = vsub.f32 0.0, %v71_v6  ;;  %v74_v11 = vsub.f32 0.0, %v72_v7  ;;  %v87_v29 = vmax.f32 %v85_v26, 0.0  ;;  %v88_v31 = vmax.f32 %v86_v27, 0.0  ;;  %s183_s7 = scalar_lea.vmem %s113_s6, 128  ;;  %p188_p3 = scmp.lt.s32.totalorder %s113_s6, %s113_s6 }
  0x2b   :  { %v65_v12 = vmul.f32 1.442695, %v63_v8  ;;  %v67_v13 = vmul.f32 1.442695, %v64_v9  ;;  %p184_p2 = scmp.ne.s32.totalorder %s113_s6, %s183_s7  ;;  %p189_p4 = scmp.lt.s32.totalorder %s183_s7, %s183_s7 }
  0x2c   :  { %v75_v14 = vmul.f32 1.442695, %v73_v10  ;;  %v77_v15 = vmul.f32 1.442695, %v74_v11  ;;  %v89_v32 = vadd.f32 %v87_v29, %v83_v28  ;;  %v90_v34 = vadd.f32 %v88_v31, %v84_v30 }
  0x2d   :  { %127 = vpow2.f32 %v65_v12  ;;  %p190_p5 = por %p189_p4, %p188_p3 }
  0x2e   :  { %129 = vpow2.f32 %v67_v13 }
  0x2f   :  { %131 = vpow2.f32 %v75_v14  ;;  %p191_p6 = pnand %p190_p5, %p184_p2 }
  0x30   :  { %133 = vpow2.f32 %v77_v15 }
  0x37   :  { %v128_v16 = vpop.eup %127 }
  0x38   :  { %v130_v17 = vpop.eup %129  ;;  %v69_v18 = vadd.f32 1.0, %v128_v16 }
  0x39   :  { %v132_v19 = vpop.eup %131  ;;  %v70_v20 = vadd.f32 1.0, %v130_v17 }
  0x3a   :  { %v134_v21 = vpop.eup %133  ;;  %v79_v22 = vadd.f32 1.0, %v132_v19 }
  0x3b   :  { %v80_v23 = vadd.f32 1.0, %v134_v21 }
  0x3c   :  { %v81_v24 = vmul.f32 %v79_v22, %v69_v18 }
  0x3d   :  { %v82_v25 = vmul.f32 %v80_v23, %v70_v20 }
  0x3e   :  { %135 = vlog2.f32 %v81_v24 }
  0x3f   :  { %137 = vlog2.f32 %v82_v25 }
  0x48   :  { %v136_v33 = vpop.eup %135 }
  0x49   :  { %v138_v35 = vpop.eup %137  ;;  %v92_v36 = vmul.f32 0.6931472, %v136_v33 }
  0x4a   :  { %v94_v37 = vmul.f32 0.6931472, %v138_v35 }
  0x4b   :  { %v95_v38 = vadd.f32 %v92_v36, %v89_v32 }
  0x4c   :  { %v96_v39 = vadd.f32 %v94_v37, %v90_v34 }
  0x4e   :  { %v98_v40 = vadd.f32 %v96_v39, %v95_v38 }
  0x50   :  { %105 = vst [vmem:[#allocation8] sm:$0xff] %v98_v40 }
  0x51   :  { %194 = shalt.err (!%p191_p6)
}
  0x52   :  { %s195_s10 = scalar_lea.hbm %s269_s2, 128 }
  0x53   :  { %p196_p7 = scmp.ne.s32.totalorder %s269_s2, %s195_s10  ;;  %p199_p8 = scmp.lt.u32.totalorder %s195_s10, %s269_s2 }
  0x55   :  { %p201_p9 = pnand %p199_p8, %p196_p7 }
  0x57   :  { %204 = shalt.err (!%p201_p9)
}
  0x58   :  { %115 = dma.vmem_to_hbm [thread:$0]  %s113_s6, 128, %s269_s2, [#allocation5]  }
  0x59   :  { %209 = dma.done.wait [#allocation5], 128  }
  0x5a   :  { %210 = vsyncadd [#allocation5], 4294967168 }
  0x5b   :  { %119 = vsyncpa [#allocation4], 1 }
  0x5c   :  { %120 = vsyncpa [#allocation7], 1 }
  0x5d   :  { %121 = vsyncpa [#allocation5], 1 }

</bundles_post_ra>
